<compile_context>
chip_gen: v7x
topology: tpu7x:2x2x1
jax: 0.10.0
libtpu: 0.0.40
codegen_flags: <defaults>
</compile_context>

<pallas_src>
import functools

import jax
import jax.numpy as jnp
from jax.experimental import pallas as pl
from jax.experimental.pallas import tpu as pltpu

_BLOCK_BUDGET_BYTES = 2 * 1024 * 1024      # ~2 MiB per block
_VMEM_LIMIT_BYTES = 32 * 1024 * 1024       # safe on v5e / v6e / v7x


def _choose_tile_hw(hw, c, budget=_BLOCK_BUDGET_BYTES):
    """Lane-axis tile: multiple of 128 (or the full extent), ~budget bytes."""
    max_hw = max(128, budget // (c * 4))
    if hw <= max_hw:
        return hw                          # full extent is always legal
    return max(128, (max_hw // 128) * 128)


def _largest_divisor_fitting(n, per_unit_bytes, budget=_BLOCK_BUDGET_BYTES):
    best = 1
    for t in range(1, n + 1):
        if n % t == 0 and t * per_unit_bytes <= budget:
            best = t
    return best


# ----------------------------------------------------------------------------
# Kernel 1: per-channel sum / sum-of-squares, accumulated in a resident
# (1, C, 1) output block across the "arbitrary" grid axes.
# ----------------------------------------------------------------------------
def _stats_kernel(x_ref, sum_ref, sumsq_ref, *, tile_hw, hw_total, need_mask):
    n_i = pl.program_id(1)
    hw_i = pl.program_id(2)

    @pl.when((n_i == 0) & (hw_i == 0))
    def _():
        sum_ref[...] = jnp.zeros_like(sum_ref)
        sumsq_ref[...] = jnp.zeros_like(sumsq_ref)

    x = x_ref[...].astype(jnp.float32)               # (tile_n, C, tile_hw)
    if need_mask:                                    # H*W tail block
        lane = jax.lax.broadcasted_iota(jnp.int32, x.shape, dimension=2)
        x = jnp.where(hw_i * tile_hw + lane < hw_total, x, 0.0)

    # Lane reduction first (C stays on sublanes -> no relayout), then fold n.
    s = jnp.sum(jnp.sum(x, axis=2, keepdims=True), axis=0)        # (C, 1)
    ss = jnp.sum(jnp.sum(x * x, axis=2, keepdims=True), axis=0)   # (C, 1)
    sum_ref[...] += s[None]
    sumsq_ref[...] += ss[None]


# ----------------------------------------------------------------------------
# Kernel 2: y = x * scale + shift, then activation (hot elementwise path).
# ----------------------------------------------------------------------------
def _bn_act_kernel(x_ref, scale_ref, shift_ref, o_ref, *, activation, slope):
    x = x_ref[...].astype(jnp.float32)               # (tile_n, C, tile_hw)
    y = x * scale_ref[...][None] + shift_ref[...][None]
    if activation == "leaky_relu":
        y = jnp.where(y >= 0, y, slope * y)
    elif activation == "relu":
        y = jnp.maximum(y, 0.0)
    elif activation == "elu":
        y = jnp.where(y >= 0, y, jnp.expm1(y))
    # "none": identity
    o_ref[...] = y.astype(o_ref.dtype)


def abn_forward(x_nchw, weight, bias, *, eps=1e-5, momentum=0.1,
                activation="leaky_relu", slope=0.01):
    """ABN forward: training-mode batch norm + activation.  x: (N, C, H, W)."""
    del momentum  # only affects running-stat buffers, not the forward output
    N, C, H, W = x_nchw.shape
    HW = H * W
    x3d = x_nchw.reshape(N, C, HW)                   # free reshape, no copy

    tile_hw = _choose_tile_hw(HW, C)
    grid_hw = pl.cdiv(HW, tile_hw)
    need_mask = (HW % tile_hw) != 0
    per_row_bytes = C * tile_hw * 4

    # ---- pass 1: per-channel sum / sumsq ------------------------------------
    # Leading "parallel" axis of size P gives v7x's two TensorCores disjoint
    # partial accumulators (no effect on single-TC v5e/v6e).
    P = 2 if (N >= 2 and N % 2 == 0) else 1
    n_per_p = N // P
    s_tile_n = _largest_divisor_fitting(n_per_p, per_row_bytes)
    s_nblocks = n_per_p // s_tile_n

    part_sum, part_sumsq = pl.pallas_call(
        functools.partial(_stats_kernel, tile_hw=tile_hw, hw_total=HW,
                          need_mask=need_mask),
        out_shape=(jax.ShapeDtypeStruct((P, C, 1), jnp.float32),
                   jax.ShapeDtypeStruct((P, C, 1), jnp.float32)),
        grid_spec=pltpu.PrefetchScalarGridSpec(
            num_scalar_prefetch=0,
            grid=(P, s_nblocks, grid_hw),
            in_specs=[pl.BlockSpec(
                (s_tile_n, C, tile_hw),
                lambda p, n, h: (p * s_nblocks + n, 0, h))],
            out_specs=(pl.BlockSpec((1, C, 1), lambda p, n, h: (p, 0, 0)),
                       pl.BlockSpec((1, C, 1), lambda p, n, h: (p, 0, 0))),
        ),
        compiler_params=pltpu.CompilerParams(
            dimension_semantics=("parallel", "arbitrary", "arbitrary"),
            vmem_limit_bytes=_VMEM_LIMIT_BYTES),
    )(x3d)

    # ---- glue: fold BN into per-channel scale / shift (tiny per-channel op) --
    count = jnp.float32(N * HW)
    sums = jnp.sum(part_sum, axis=0)                 # (C, 1)
    sumsqs = jnp.sum(part_sumsq, axis=0)             # (C, 1)
    mean = sums / count
    # E[x^2] - E[x]^2 in f32; clamp guards tiny negative variances from
    # cancellation (matches biased variance of torch.batch_norm training mode).
    var = jnp.maximum(sumsqs / count - mean * mean, 0.0)
    inv_std = jax.lax.rsqrt(var + eps)
    w = weight.reshape(C, 1).astype(jnp.float32)
    b = bias.reshape(C, 1).astype(jnp.float32)
    scale = inv_std * w                              # (C, 1)
    shift = b - mean * scale                         # (C, 1)
    # TODO(synk): PyTorch ABN also updates running_mean/running_var buffers in
    # training mode (stateful side effect); they do not affect this output.

    # ---- pass 2: normalize + affine + activation ----------------------------
    o_tile_n = _largest_divisor_fitting(N, per_row_bytes)
    grid_n = N // o_tile_n

    y3d = pl.pallas_call(
        functools.partial(_bn_act_kernel, activation=activation, slope=slope),
        out_shape=jax.ShapeDtypeStruct((N, C, HW), x3d.dtype),
        grid_spec=pltpu.PrefetchScalarGridSpec(
            num_scalar_prefetch=0,
            grid=(grid_n, grid_hw),
            in_specs=[
                pl.BlockSpec((o_tile_n, C, tile_hw), lambda n, h: (n, 0, h)),
                pl.BlockSpec((C, 1), lambda n, h: (0, 0)),   # scale
                pl.BlockSpec((C, 1), lambda n, h: (0, 0)),   # shift
            ],
            out_specs=pl.BlockSpec((o_tile_n, C, tile_hw),
                                   lambda n, h: (n, 0, h)),
        ),
        compiler_params=pltpu.CompilerParams(
            dimension_semantics=("parallel", "parallel"),
            vmem_limit_bytes=_VMEM_LIMIT_BYTES),
    )(x3d, scale, shift)

    return y3d.reshape(N, C, H, W)                   # free reshape back


def _reference_abn(x, weight, bias, eps=1e-5, slope=0.01):
    """Pure-JAX reference: training-mode BN over (N,H,W) + leaky_relu."""
    mean = jnp.mean(x, axis=(0, 2, 3), keepdims=True)
    var = jnp.mean((x - mean) ** 2, axis=(0, 2, 3), keepdims=True)  # biased
    y = (x - mean) / jnp.sqrt(var + eps)
    y = y * weight.reshape(1, -1, 1, 1) + bias.reshape(1, -1, 1, 1)
    return jnp.where(y >= 0, y, slope * y)


if __name__ == "__main__":
    key = jax.random.PRNGKey(0)
    N, C, H, W = 2, 4, 16, 16            # NCHW, matches ABN(num_features=4)

    x = jax.random.normal(key, (N, C, H, W), dtype=jnp.float32)
    # Deterministic parameters per ABN.reset_parameters(): weight=1, bias=0.
    weight = jnp.ones((C,), dtype=jnp.float32)
    bias = jnp.zeros((C,), dtype=jnp.float32)

    fwd = jax.jit(functools.partial(abn_forward, eps=1e-5, slope=0.01))
    out = jax.block_until_ready(fwd(x, weight, bias))

    ref = _reference_abn(x, weight, bias)
    assert out.shape == (N, C, H, W)
    assert jnp.allclose(out, ref, atol=1e-4, rtol=1e-4), "mismatch vs reference"

    print("KERNEL_OK")
</pallas_src>

<mosaic_0001>
module attributes {stable_mosaic.version = 11 : i64} {
  func.func @_stats_kernel(%arg0: i32, %arg1: i32, %arg2: i32, %arg3: memref<1x4x256xf32, #tpu.memory_space<vmem>>, %arg4: memref<1x4x1xf32, #tpu.memory_space<vmem>>, %arg5: memref<1x4x1xf32, #tpu.memory_space<vmem>>) attributes {dimension_semantics = [#tpu.dimension_semantics<parallel>, #tpu.dimension_semantics<arbitrary>, #tpu.dimension_semantics<arbitrary>], iteration_bounds = array<i64: 2, 1, 1>, scalar_prefetch = 0 : i64, scratch_operands = 0 : i64, tpu.core_type = #tpu.core_type<tc>, window_params = [{transform_indices = @transform_0, window_bounds = array<i64: 1, 4, 256>}, {transform_indices = @transform_1, window_bounds = array<i64: 1, 4, 1>}, {transform_indices = @transform_2, window_bounds = array<i64: 1, 4, 1>}]} {
    %c0_i32 = arith.constant 0 : i32
    %0 = arith.cmpi eq, %arg1, %c0_i32 : i32
    %c0_i32_0 = arith.constant 0 : i32
    %1 = arith.cmpi eq, %arg2, %c0_i32_0 : i32
    %2 = arith.andi %0, %1 : i1
    %3 = arith.extui %2 : i1 to i32
    %c0_i32_1 = arith.constant 0 : i32
    %4 = arith.cmpi ne, %3, %c0_i32_1 : i32
    scf.if %4 {
      %cst_19 = arith.constant 0.000000e+00 : f32
      %21 = vector.broadcast %cst_19 : f32 to vector<1x4x1xf32>
      %c0_20 = arith.constant 0 : index
      %c0_21 = arith.constant 0 : index
      %c0_22 = arith.constant 0 : index
      %22 = vector.load %arg4[%c0_20, %c0_21, %c0_22] : memref<1x4x1xf32, #tpu.memory_space<vmem>>, vector<1x4x1xf32>
      tpu.vector_store %arg4[%c0_20, %c0_21, %c0_22], %21 {strides = array<i32>} : memref<1x4x1xf32, #tpu.memory_space<vmem>>, vector<1x4x1xf32>,
      %cst_23 = arith.constant 0.000000e+00 : f32
      %23 = vector.broadcast %cst_23 : f32 to vector<1x4x1xf32>
      %c0_24 = arith.constant 0 : index
      %c0_25 = arith.constant 0 : index
      %c0_26 = arith.constant 0 : index
      %24 = vector.load %arg5[%c0_24, %c0_25, %c0_26] : memref<1x4x1xf32, #tpu.memory_space<vmem>>, vector<1x4x1xf32>
      tpu.vector_store %arg5[%c0_24, %c0_25, %c0_26], %23 {strides = array<i32>} : memref<1x4x1xf32, #tpu.memory_space<vmem>>, vector<1x4x1xf32>,
    } else {
    }
    %c0 = arith.constant 0 : index
    %c0_2 = arith.constant 0 : index
    %c0_3 = arith.constant 0 : index
    %5 = vector.load %arg3[%c0, %c0_2, %c0_3] : memref<1x4x256xf32, #tpu.memory_space<vmem>>, vector<1x4x256xf32>
    %cst = arith.constant dense<0.000000e+00> : vector<1x4xf32>
    %6 = vector.multi_reduction <add>, %5, %cst [2] : vector<1x4x256xf32> to vector<1x4xf32>
    %7 = vector.shape_cast %6 : vector<1x4xf32> to vector<1x4x1xf32>
    %cst_4 = arith.constant dense<0.000000e+00> : vector<4x1xf32>
    %8 = vector.multi_reduction <add>, %7, %cst_4 [0] : vector<1x4x1xf32> to vector<4x1xf32>
    %9 = arith.mulf %5, %5 : vector<1x4x256xf32>
    %cst_5 = arith.constant dense<0.000000e+00> : vector<1x4xf32>
    %10 = vector.multi_reduction <add>, %9, %cst_5 [2] : vector<1x4x256xf32> to vector<1x4xf32>
    %11 = vector.shape_cast %10 : vector<1x4xf32> to vector<1x4x1xf32>
    %cst_6 = arith.constant dense<0.000000e+00> : vector<4x1xf32>
    %12 = vector.multi_reduction <add>, %11, %cst_6 [0] : vector<1x4x1xf32> to vector<4x1xf32>
    %c0_7 = arith.constant 0 : index
    %c0_8 = arith.constant 0 : index
    %c0_9 = arith.constant 0 : index
    %13 = vector.load %arg4[%c0_7, %c0_8, %c0_9] : memref<1x4x1xf32, #tpu.memory_space<vmem>>, vector<1x4x1xf32>
    %14 = vector.shape_cast %8 : vector<4x1xf32> to vector<1x4x1xf32>
    %15 = arith.addf %13, %14 : vector<1x4x1xf32>
    %c0_10 = arith.constant 0 : index
    %c0_11 = arith.constant 0 : index
    %c0_12 = arith.constant 0 : index
    %16 = vector.load %arg4[%c0_10, %c0_11, %c0_12] : memref<1x4x1xf32, #tpu.memory_space<vmem>>, vector<1x4x1xf32>
    tpu.vector_store %arg4[%c0_10, %c0_11, %c0_12], %15 {strides = array<i32>} : memref<1x4x1xf32, #tpu.memory_space<vmem>>, vector<1x4x1xf32>,
    %c0_13 = arith.constant 0 : index
    %c0_14 = arith.constant 0 : index
    %c0_15 = arith.constant 0 : index
    %17 = vector.load %arg5[%c0_13, %c0_14, %c0_15] : memref<1x4x1xf32, #tpu.memory_space<vmem>>, vector<1x4x1xf32>
    %18 = vector.shape_cast %12 : vector<4x1xf32> to vector<1x4x1xf32>
    %19 = arith.addf %17, %18 : vector<1x4x1xf32>
    %c0_16 = arith.constant 0 : index
    %c0_17 = arith.constant 0 : index
    %c0_18 = arith.constant 0 : index
    %20 = vector.load %arg5[%c0_16, %c0_17, %c0_18] : memref<1x4x1xf32, #tpu.memory_space<vmem>>, vector<1x4x1xf32>
    tpu.vector_store %arg5[%c0_16, %c0_17, %c0_18], %19 {strides = array<i32>} : memref<1x4x1xf32, #tpu.memory_space<vmem>>, vector<1x4x1xf32>,
    return
  }
  func.func @transform_0(%arg0: i32, %arg1: i32, %arg2: i32) -> (i32, i32, i32) {
    %c1_i32 = arith.constant 1 : i32
    %0 = arith.muli %arg0, %c1_i32 : i32
    %1 = arith.addi %0, %arg1 : i32
    %c0_i32 = arith.constant 0 : i32
    %c0_i32_0 = arith.constant 0 : i32
    return %1, %c0_i32, %arg2 : i32, i32, i32
  }
  func.func @transform_1(%arg0: i32, %arg1: i32, %arg2: i32) -> (i32, i32, i32) {
    %c0_i32 = arith.constant 0 : i32
    %c0_i32_0 = arith.constant 0 : i32
    %c0_i32_1 = arith.constant 0 : i32
    return %arg0, %c0_i32, %c0_i32_0 : i32, i32, i32
  }
  func.func @transform_2(%arg0: i32, %arg1: i32, %arg2: i32) -> (i32, i32, i32) {
    %c0_i32 = arith.constant 0 : i32
    %c0_i32_0 = arith.constant 0 : i32
    %c0_i32_1 = arith.constant 0 : i32
    return %arg0, %c0_i32, %c0_i32_0 : i32, i32, i32
  }
}

module attributes {stable_mosaic.version = 11 : i64} {
  func.func @_bn_act_kernel(%arg0: i32, %arg1: i32, %arg2: memref<2x4x256xf32, #tpu.memory_space<vmem>>, %arg3: memref<4x1xf32, #tpu.memory_space<vmem>>, %arg4: memref<4x1xf32, #tpu.memory_space<vmem>>, %arg5: memref<2x4x256xf32, #tpu.memory_space<vmem>>) attributes {dimension_semantics = [#tpu.dimension_semantics<parallel>, #tpu.dimension_semantics<parallel>], iteration_bounds = array<i64: 1, 1>, scalar_prefetch = 0 : i64, scratch_operands = 0 : i64, tpu.core_type = #tpu.core_type<tc>, window_params = [{transform_indices = @transform_0, window_bounds = array<i64: 2, 4, 256>}, {pipeline_mode = #tpu.pipeline_mode<synchronous>, transform_indices = @transform_1, window_bounds = array<i64: 4, 1>}, {pipeline_mode = #tpu.pipeline_mode<synchronous>, transform_indices = @transform_2, window_bounds = array<i64: 4, 1>}, {transform_indices = @transform_3, window_bounds = array<i64: 2, 4, 256>}]} {
    %c0 = arith.constant 0 : index
    %c0_0 = arith.constant 0 : index
    %c0_1 = arith.constant 0 : index
    %0 = vector.load %arg2[%c0, %c0_0, %c0_1] : memref<2x4x256xf32, #tpu.memory_space<vmem>>, vector<2x4x256xf32>
    %c0_2 = arith.constant 0 : index
    %c0_3 = arith.constant 0 : index
    %1 = vector.load %arg3[%c0_2, %c0_3] : memref<4x1xf32, #tpu.memory_space<vmem>>, vector<4x1xf32>
    %2 = vector.shape_cast %1 : vector<4x1xf32> to vector<1x4x1xf32>
    %3 = vector.broadcast %2 : vector<1x4x1xf32> to vector<2x4x256xf32>
    %4 = arith.mulf %0, %3 : vector<2x4x256xf32>
    %c0_4 = arith.constant 0 : index
    %c0_5 = arith.constant 0 : index
    %5 = vector.load %arg4[%c0_4, %c0_5] : memref<4x1xf32, #tpu.memory_space<vmem>>, vector<4x1xf32>
    %6 = vector.shape_cast %5 : vector<4x1xf32> to vector<1x4x1xf32>
    %7 = vector.broadcast %6 : vector<1x4x1xf32> to vector<2x4x256xf32>
    %8 = arith.addf %4, %7 : vector<2x4x256xf32>
    %cst = arith.constant 0.000000e+00 : f32
    %9 = vector.broadcast %cst : f32 to vector<2x4x256xf32>
    %10 = arith.cmpf oge, %8, %9 : vector<2x4x256xf32>
    %cst_6 = arith.constant 0.00999999977 : f32
    %11 = vector.broadcast %cst_6 : f32 to vector<2x4x256xf32>
    %12 = arith.mulf %11, %8 : vector<2x4x256xf32>
    %13 = arith.select %10, %8, %12 : vector<2x4x256xi1>, vector<2x4x256xf32>
    %c0_7 = arith.constant 0 : index
    %c0_8 = arith.constant 0 : index
    %c0_9 = arith.constant 0 : index
    %14 = vector.load %arg5[%c0_7, %c0_8, %c0_9] : memref<2x4x256xf32, #tpu.memory_space<vmem>>, vector<2x4x256xf32>
    tpu.vector_store %arg5[%c0_7, %c0_8, %c0_9], %13 {strides = array<i32>} : memref<2x4x256xf32, #tpu.memory_space<vmem>>, vector<2x4x256xf32>,
    return
  }
  func.func @transform_0(%arg0: i32, %arg1: i32) -> (i32, i32, i32) {
    %c0_i32 = arith.constant 0 : i32
    %c0_i32_0 = arith.constant 0 : i32
    return %arg0, %c0_i32, %arg1 : i32, i32, i32
  }
  func.func @transform_1(%arg0: i32, %arg1: i32) -> (i32, i32) {
    %c0_i32 = arith.constant 0 : i32
    %c0_i32_0 = arith.constant 0 : i32
    %c0_i32_1 = arith.constant 0 : i32
    return %c0_i32, %c0_i32_0 : i32, i32
  }
  func.func @transform_2(%arg0: i32, %arg1: i32) -> (i32, i32) {
    %c0_i32 = arith.constant 0 : i32
    %c0_i32_0 = arith.constant 0 : i32
    %c0_i32_1 = arith.constant 0 : i32
    return %c0_i32, %c0_i32_0 : i32, i32
  }
  func.func @transform_3(%arg0: i32, %arg1: i32) -> (i32, i32, i32) {
    %c0_i32 = arith.constant 0 : i32
    %c0_i32_0 = arith.constant 0 : i32
    return %arg0, %c0_i32, %arg1 : i32, i32, i32
  }
}

</mosaic_0001>

<bundles_post_ra>
// kernel: abn_forward.2
= control target key start
LH: loop header
LB: loop body
LE: loop exit
PB: predicated region body
PF: predicated region fallthrough
CT: control target
= control target key end

     0   :  { %s411_s9 = smov 0   ;;  %s413_s10 = smov 0   ;;  %s451_s0 = inlined_call_operand.vmem [shape: f32[2,4,256], index: 0, kind: input, shape index: {}]   ;;  %s452_s1 = inlined_call_operand.vmem [shape: f32[2,4,1], index: 1, kind: output, shape index: {0}]   ;;  %s453_s2 = inlined_call_operand.vmem [shape: f32[2,4,1], index: 2, kind: output, shape index: {1}]  }
   0x1   :  { %s415_s11 = smov 0  }
   0x2 LB: > { %s32_s12 = sadd.s32 1, %s389_s10  ;;  %p337_p0 = scmp.ge.s32.totalorder %s393_s11, 1  ;;  %s393_s11 = sphi %s415_s11, %s13_s11   ;;  %s389_s10 = sphi %s413_s10, %s455_s10   ;;  %s385_s9 = sphi %s411_s9, %s454_s9  }
   0x3   : > { %p34_p1 = scmp.ge.s32.totalorder %s32_s12, 2  ;;  %p145_p2 = scmp.lt.s32.totalorder %s393_s11, 3 }
   0x5   : > { %s457_s12 = smov (%p34_p1, %s32_s12), 0  ;;  %p146_p3 = pnand %p337_p0, %p145_p2 }
   0x6   : > { %p177_p4 = scmp.lt.s32.totalorder (!%p146_p3), %s385_s9, 1  ;;  %vm201_vm0 = vcmask (!%p146_p3), 3072   ;;  %vm208_vm1 = vcmask (!%p146_p3), 1043456   ;;  %v395_v1 = vmov (!%p146_p3), 0.0  }
   0x7   : > { %149 = sbr.rel (%p146_p3) target bundleno = 172 (0xac), region = 24 }
   0xe   : > { %s459_s9 = smov (!%p177_p4, %s385_s9), 1 }
   0xf   : > { %s344_s13 = sshll.u32 %s459_s9, 3  ;;  %s340_s14 = sshll.u32 %s459_s9, 2 }
  0x10   : > { %s184_s17 = scalar_lea.vmem %s451_s0, %s344_s13  ;;  %s190_s20 = scalar_lea.vmem %s452_s1, %s340_s14 }
  0x11   : > { %v204_v0 = vld [vmem:[%s184_s17] sm:$0xff]  ;;  %202 = vst.msk [vmem:[%s190_s20] sm:$0xf] %vm201_vm0, %v395_v1  ;;  %s194_s23 = scalar_lea.vmem %s453_s2, %s340_s14 }
  0x12   : > { %v206_v2 = vcombine.high %v204_v0, %v204_v0  ;;  %v209_v3 = vsel %vm208_vm1, %v204_v0, 0.0  ;;  %v215_v4 = vmul.f32 %v204_v0, %v204_v0  ;;  %203 = vst.msk [vmem:[%s194_s23] sm:$0xf] %vm201_vm0, %v395_v1 }
  0x14   : > { %v210_v5 = vsel %vm208_vm1, %v206_v2, 0.0  ;;  %v217_v6 = vcombine.high %v215_v4, %v215_v4  ;;  %v219_v7 = vsel %vm208_vm1, %v215_v4, 0.0 }
  0x15   : > { %v211_v8 = vadd.f32 %v210_v5, %v209_v3 }
  0x16   : > { %v220_v9 = vsel %vm208_vm1, %v217_v6, 0.0 }
  0x17   : > { %212 = vadd.xlane.f32.xlu0 %v211_v8  ;;  %v221_v10 = vadd.f32 %v220_v9, %v219_v7 }
  0x18   : > { %v225_v11 = vld [vmem:[%s190_s20] sm:$0xf] }
  0x19   : > { %v229_v14 = vld [vmem:[%s194_s23] sm:$0xf] }
  0x1b   : > { %222 = vadd.xlane.f32.xlu0 %v221_v10 }
  0xa4   : > { %v213_v12 = vpop.xlane.xlu0 %212 }
  0xa5   : > { %v226_v13 = vadd.f32 %v225_v11, %v213_v12 }
  0xa7   : > { %228 = vst.msk [vmem:[%s190_s20] sm:$0xf] %vm201_vm0, %v226_v13 }
  0xa8   : > { %v223_v15 = vpop.xlane.xlu0 %222 }
  0xa9   : > { %v230_v16 = vadd.f32 %v229_v14, %v223_v15 }
  0xab   : > { %231 = vst.msk [vmem:[%s194_s23] sm:$0xf] %vm201_vm0, %v230_v16 }
  0xac PF: > { %s13_s11 = sadd.s32 1, %s393_s11   ;;  %s454_s9 = smov %s389_s10 }
  0xad   : > { %p10_p5 = scmp.ge.s32.totalorder %s13_s11, 4   ;;  %s455_s10 = smov %s457_s12 }
  0xaf   :  { %12 = sbr.rel (!%p10_p5) target bundleno = 2 (0x2), region = 70 }

// kernel: abn_forward.3
= control target key start
LH: loop header
LB: loop body
LE: loop exit
PB: predicated region body
PF: predicated region fallthrough
CT: control target
= control target key end

     0   :  { %v61_v0 = vmov 0   ;;  %v62_v3 = vmov 839922192   ;;  %v24_v5 = vlaneseq  ;;  %s101_s1 = inlined_call_operand.vmem [shape: f32[4,1], index: 1, kind: input, shape index: {}]   ;;  %s102_s2 = inlined_call_operand.vmem [shape: f32[4,1], index: 2, kind: input, shape index: {}]   ;;  %s103_s0 = inlined_call_operand.vmem [shape: f32[2,4,256], index: 0, kind: input, shape index: {}]   ;;  %s104_s3 = inlined_call_operand.vmem [shape: f32[2,4,256], index: 3, kind: output, shape index: {}]  }
   0x1   :  { %60 = vset.pattern.permute.xlu0 %v61_v0  ;;  %v16_v1 = vld [vmem:[%s101_s1] sm:$0xf]  ;;  %v22_v4 = vunpack.c.l.s4 %v62_v3  ;;  %v15_v12 = vld [vmem:[%s103_s0 + $0x8] sm:$0xff] }
   0x2   :  { %19 = vperm.xlu0 %60, %v16_v1   ;;  %v31_v2 = vld [vmem:[%s102_s2] sm:$0xf]  ;;  %v25_v7 = vshrl.u32 %v24_v5, 7 }
   0x3   :  { %v23_v6 = vunpack.c.0.s8 %v22_v4  ;;  %v14_v11 = vld [vmem:[%s103_s0] sm:$0xff] }
   0x5   :  { %v26_v8 = vsub.s32 %v23_v6, %v25_v7 }
   0x6   :  { %34 = vperm.xlu0 %60, %v31_v2  }
  0x81   :  { %v20_v9 = vpop.permute.xlu0 %19 }
  0x82   :  { %v27_v10 = vrot.slane %v20_v9, %v26_v8 }
  0x84   :  { %v29_v14 = vmul.f32 %v27_v10, %v14_v11  ;;  %v30_v15 = vmul.f32 %v27_v10, %v15_v12 }
  0x85   :  { %v35_v13 = vpop.permute.xlu0 %34 }
  0x86   :  { %v42_v16 = vrot.slane %v35_v13, %v26_v8 }
  0x88   :  { %v44_v17 = vadd.f32 %v42_v16, %v29_v14  ;;  %v45_v18 = vadd.f32 %v42_v16, %v30_v15 }
  0x8a   :  { %vm46_vm0 = vcmp.ge.f32.partialorder %v44_v17, 0.0  ;;  %vm47_vm1 = vcmp.ge.f32.partialorder %v45_v18, 0.0  ;;  %v48_v19 = vmul.f32 0.01, %v44_v17  ;;  %v49_v20 = vmul.f32 0.01, %v45_v18 }
  0x8c   :  { %v50_v21 = vsel %vm46_vm0, %v44_v17, %v48_v19  ;;  %v51_v22 = vsel %vm47_vm1, %v45_v18, %v49_v20 }
  0x8d   :  { %52 = vst [vmem:[%s104_s3] sm:$0xff] %v50_v21  ;;  %53 = vst [vmem:[%s104_s3 + $0x8] sm:$0xff] %v51_v22 }

</bundles_post_ra>
